<compile_context>
chip_gen: v7x
topology: tpu7x:2x2x1
jax: 0.10.0
libtpu: 0.0.40
codegen_flags: <defaults>
</compile_context>

<pallas_src>
import functools
import math

import jax
import jax.numpy as jnp
from jax.experimental import pallas as pl
from jax.experimental.pallas import tpu as pltpu


def _focal_loss_kernel(x_ref, t_ref, alpha_ref, out_ref, *, gamma, n_valid,
                       tiles_per_split, tile_n):
    s = pl.program_id(0)          # split (parallel) index
    i = pl.program_id(1)          # reduction (arbitrary) index

    @pl.when(i == 0)
    def _():
        out_ref[...] = jnp.zeros_like(out_ref)

    x = x_ref[...].astype(jnp.float32)            # (TN, C) logits
    t = t_ref[...]                                # (TN, 1) int32 targets
    a_row = alpha_ref[...].astype(jnp.float32)    # (1, C)  alpha[:,0]+alpha[:,1]

    tn, c = x.shape

    # one-hot class mask via iota compare (scatter_ equivalent)
    col = jax.lax.broadcasted_iota(jnp.int32, (tn, c), 1)
    class_mask = (col == t).astype(jnp.float32)   # (TN, C)

    # log-softmax picked at the target class:
    #   log p_t = (x_t - m) - log(sum exp(x - m))
    m = jnp.max(x, axis=1, keepdims=True)                      # (TN, 1)
    sumexp = jnp.sum(jnp.exp(x - m), axis=1, keepdims=True)    # (TN, 1)
    x_t = jnp.sum(class_mask * x, axis=1, keepdims=True)       # (TN, 1)
    log_p = (x_t - m) - jnp.log(sumexp)
    # clamp(probs, 1e-4, 1.0)  ==  max(log_p, log(1e-4)) in log space
    log_p = jnp.maximum(log_p, jnp.float32(math.log(1e-4)))
    probs = jnp.exp(log_p)

    # alpha[target, 0] + alpha[target, 1] via the same masked reduce (no MXU)
    alpha_w = jnp.sum(class_mask * a_row, axis=1, keepdims=True)  # (TN, 1)

    one_minus = 1.0 - probs
    g = float(gamma)
    if g == 0.0:
        focal = jnp.ones_like(one_minus)
    elif g == int(g) and 0 < int(g) <= 4:
        focal = one_minus
        for _ in range(int(g) - 1):              # VPU multiplies, no pow/EUP
            focal = focal * one_minus
    else:
        focal = jnp.power(one_minus, jnp.float32(g))

    row_loss = -alpha_w * focal * log_p          # (TN, 1); == batch_loss.sum(1)

    # mask padded rows (N rounded up to num_splits * tiles_per_split * TN)
    row0 = (s * tiles_per_split + i) * tile_n
    ridx = row0 + jax.lax.broadcasted_iota(jnp.int32, (tn, 1), 0)
    row_loss = jnp.where(ridx < n_valid, row_loss, 0.0)

    out_ref[...] = out_ref[...] + jnp.sum(row_loss)


def _pick_tile_n(n, c):
    # Per-step VMEM: logits tile (lanes padded to >=128) + lane-padded (TN, 1)
    # int32 targets tile, double-buffered.  Budget ~2 MiB for the logits buffer
    # so the pipeline stays far below even v5e's 16 MiB scoped-VMEM default
    # (and v7x's 64 MiB physical VMEM) with no vmem_limit_bytes override, while
    # TN is large enough to amortize the ~0.35 us/step grid overhead.
    per_row_bytes = (max(c, 128) + 128) * 4
    tn = (2 * 1024 * 1024 // per_row_bytes) // 8 * 8
    return int(max(8, min(1024, tn)))


def focal_loss_pallas(inputs, targets, alpha, *, gamma=2.0, size_average=True,
                      tile_n=None, num_splits=1):
    """inputs: (N, C) logits (any float dtype); targets: (N,) ints; alpha: (C, 2)."""
    n, c = inputs.shape
    targets = targets.reshape(n, 1).astype(jnp.int32)
    # batch_loss (N, 2) is reduced over both axes, so fold alpha's two columns
    # into one (1, C) row:  sum_j alpha[t, j] * f(t) == (alpha[t,0]+alpha[t,1]) * f(t)
    alpha_row = jnp.sum(alpha.astype(jnp.float32), axis=1).reshape(1, c)

    if tile_n is None:
        tile_n = _pick_tile_n(n, c)
    if n <= tile_n:
        tile_n = n                      # single full block (satisfies tiling rule)
    n_tiles = pl.cdiv(n, tile_n)
    # TODO(synk): auto-set num_splits=2 on v7x (2 TensorCores/chip) once a
    # robust chip-version query is available; the "parallel" axis is already
    # wired for it and is free when num_splits == 1.
    num_splits = int(max(1, min(num_splits, n_tiles)))
    tiles_per_split = int(pl.cdiv(n_tiles, num_splits))
    n_padded = num_splits * tiles_per_split * tile_n
    if n_padded != n:
        inputs = jnp.pad(inputs, ((0, n_padded - n), (0, 0)))
        targets = jnp.pad(targets, ((0, n_padded - n), (0, 0)))

    kernel = functools.partial(
        _focal_loss_kernel, gamma=float(gamma), n_valid=int(n),
        tiles_per_split=tiles_per_split, tile_n=int(tile_n))

    partials = pl.pallas_call(
        kernel,
        out_shape=jax.ShapeDtypeStruct((num_splits, 1, 1), jnp.float32),
        grid=(num_splits, tiles_per_split),
        in_specs=[
            # logits stream; no wrapper dtype cast (kernel upcasts in-register)
            pl.BlockSpec((tile_n, c), lambda s, i: (s * tiles_per_split + i, 0)),
            pl.BlockSpec((tile_n, 1), lambda s, i: (s * tiles_per_split + i, 0)),
            pl.BlockSpec((1, c), lambda s, i: (0, 0)),      # folded alpha row
        ],
        # one resident (1, 1, 1) partial-sum block per split (accumulator)
        out_specs=pl.BlockSpec((1, 1, 1), lambda s, i: (s, 0, 0)),
        compiler_params=pltpu.CompilerParams(
            dimension_semantics=("parallel", "arbitrary")),
    )(inputs, targets, alpha_row)

    total = jnp.sum(partials)
    if size_average:
        total = total / jnp.float32(n * 2)   # mean over the (N, 2) batch_loss
    return total


def _focal_loss_ref(inputs, targets, alpha, *, gamma=2.0, size_average=True):
    """Pure-JAX reference mirroring the PyTorch forward, for validation."""
    n, c = inputs.shape
    p = jax.nn.softmax(inputs.astype(jnp.float32), axis=1)
    class_mask = jax.nn.one_hot(targets, c, dtype=jnp.float32)
    probs = jnp.clip(jnp.sum(p * class_mask, axis=1, keepdims=True), 0.0001, 1.0)
    log_p = jnp.log(probs)
    alpha_sel = alpha.astype(jnp.float32)[targets]          # (N, 2)
    batch_loss = -alpha_sel * jnp.power(1.0 - probs, gamma) * log_p
    return jnp.mean(batch_loss) if size_average else jnp.sum(batch_loss)


if __name__ == "__main__":
    class_num = 10
    key = jax.random.PRNGKey(0)
    k_x1, k_t1, k_x2, k_t2, k_a = jax.random.split(key, 5)

    # Case 1: module defaults (alpha=None -> ones, gamma=2, size_average=True),
    # single full-block tile.
    n1 = 8
    x1 = jax.random.normal(k_x1, (n1, class_num), dtype=jnp.float32)
    t1 = jax.random.randint(k_t1, (n1,), 0, class_num, dtype=jnp.int32)
    a1 = jnp.ones((class_num, 2), dtype=jnp.float32)
    out1 = jax.block_until_ready(
        focal_loss_pallas(x1, t1, a1, gamma=2.0, size_average=True))
    ref1 = _focal_loss_ref(x1, t1, a1, gamma=2.0, size_average=True)
    assert jnp.allclose(out1, ref1, rtol=1e-5, atol=1e-6), (out1, ref1)

    # Case 2: non-divisible N, forced small tiles + 2-way split (exercises the
    # tiled accumulator, the padding/row mask, and the parallel partial-sum
    # axis), non-trivial alpha, size_average=False.
    n2 = 13
    x2 = jax.random.normal(k_x2, (n2, class_num), dtype=jnp.float32)
    t2 = jax.random.randint(k_t2, (n2,), 0, class_num, dtype=jnp.int32)
    a2 = jax.random.uniform(k_a, (class_num, 2), dtype=jnp.float32)
    out2 = jax.block_until_ready(
        focal_loss_pallas(x2, t2, a2, gamma=2.0, size_average=False,
                          tile_n=8, num_splits=2))
    ref2 = _focal_loss_ref(x2, t2, a2, gamma=2.0, size_average=False)
    assert jnp.allclose(out2, ref2, rtol=1e-5, atol=1e-5), (out2, ref2)

    print("KERNEL_OK")
</pallas_src>

<mosaic_0001>
module attributes {stable_mosaic.version = 11 : i64} {
  func.func @_focal_loss_kernel(%arg0: i32, %arg1: i32, %arg2: memref<8x10xf32, #tpu.memory_space<vmem>>, %arg3: memref<8x1xi32, #tpu.memory_space<vmem>>, %arg4: memref<1x10xf32, #tpu.memory_space<vmem>>, %arg5: memref<1x1x1xf32, #tpu.memory_space<vmem>>) attributes {dimension_semantics = [#tpu.dimension_semantics<parallel>, #tpu.dimension_semantics<arbitrary>], iteration_bounds = array<i64: 1, 1>, scalar_prefetch = 0 : i64, scratch_operands = 0 : i64, tpu.core_type = #tpu.core_type<tc>, window_params = [{transform_indices = @transform_0, window_bounds = array<i64: 8, 10>}, {transform_indices = @transform_1, window_bounds = array<i64: 8, 1>}, {pipeline_mode = #tpu.pipeline_mode<synchronous>, transform_indices = @transform_2, window_bounds = array<i64: 1, 10>}, {transform_indices = @transform_3, window_bounds = array<i64: 1, 1, 1>}]} {
    %c0_i32 = arith.constant 0 : i32
    %0 = arith.cmpi eq, %arg1, %c0_i32 : i32
    %1 = arith.extui %0 : i1 to i32
    %c0_i32_0 = arith.constant 0 : i32
    %2 = arith.cmpi ne, %1, %c0_i32_0 : i32
    scf.if %2 {
      %cst_21 = arith.constant 0.000000e+00 : f32
      %56 = vector.broadcast %cst_21 : f32 to vector<1x1x1xf32>
      %c0_22 = arith.constant 0 : index
      %c0_23 = arith.constant 0 : index
      %c0_24 = arith.constant 0 : index
      %57 = vector.load %arg5[%c0_22, %c0_23, %c0_24] : memref<1x1x1xf32, #tpu.memory_space<vmem>>, vector<1x1x1xf32>
      tpu.vector_store %arg5[%c0_22, %c0_23, %c0_24], %56 {strides = array<i32>} : memref<1x1x1xf32, #tpu.memory_space<vmem>>, vector<1x1x1xf32>,
    } else {
    }
    %c0 = arith.constant 0 : index
    %c0_1 = arith.constant 0 : index
    %3 = vector.load %arg2[%c0, %c0_1] : memref<8x10xf32, #tpu.memory_space<vmem>>, vector<8x10xf32>
    %c0_2 = arith.constant 0 : index
    %c0_3 = arith.constant 0 : index
    %4 = vector.load %arg3[%c0_2, %c0_3] : memref<8x1xi32, #tpu.memory_space<vmem>>, vector<8x1xi32>
    %c0_4 = arith.constant 0 : index
    %c0_5 = arith.constant 0 : index
    %5 = vector.load %arg4[%c0_4, %c0_5] : memref<1x10xf32, #tpu.memory_space<vmem>>, vector<1x10xf32>
    %6 = tpu.iota {dimensions = array<i32: 1>} : vector<8x10xi32>
    %7 = vector.broadcast %4 : vector<8x1xi32> to vector<8x10xi32>
    %8 = arith.cmpi eq, %6, %7 : vector<8x10xi32>
    %9 = arith.extui %8 : vector<8x10xi1> to vector<8x10xi32>
    %10 = arith.sitofp %9 : vector<8x10xi32> to vector<8x10xf32>
    %cst = arith.constant dense<0xFF800000> : vector<8xf32>
    %11 = vector.multi_reduction <maximumf>, %3, %cst [1] : vector<8x10xf32> to vector<8xf32>
    %12 = vector.shape_cast %11 : vector<8xf32> to vector<8x1xf32>
    %13 = vector.broadcast %12 : vector<8x1xf32> to vector<8x10xf32>
    %14 = arith.subf %3, %13 : vector<8x10xf32>
    %15 = math.exp %14 : vector<8x10xf32>
    %cst_6 = arith.constant dense<0.000000e+00> : vector<8xf32>
    %16 = vector.multi_reduction <add>, %15, %cst_6 [1] : vector<8x10xf32> to vector<8xf32>
    %17 = vector.shape_cast %16 : vector<8xf32> to vector<8x1xf32>
    %18 = arith.mulf %10, %3 : vector<8x10xf32>
    %cst_7 = arith.constant dense<0.000000e+00> : vector<8xf32>
    %19 = vector.multi_reduction <add>, %18, %cst_7 [1] : vector<8x10xf32> to vector<8xf32>
    %20 = vector.shape_cast %19 : vector<8xf32> to vector<8x1xf32>
    %21 = arith.subf %20, %12 : vector<8x1xf32>
    %22 = math.log %17 : vector<8x1xf32>
    %23 = arith.subf %21, %22 : vector<8x1xf32>
    %cst_8 = arith.constant -9.21034049 : f32
    %24 = vector.broadcast %cst_8 : f32 to vector<8x1xf32>
    %25 = arith.maximumf %23, %24 : vector<8x1xf32>
    %26 = math.exp %25 : vector<8x1xf32>
    %27 = vector.broadcast %5 : vector<1x10xf32> to vector<8x10xf32>
    %28 = arith.mulf %10, %27 : vector<8x10xf32>
    %cst_9 = arith.constant dense<0.000000e+00> : vector<8xf32>
    %29 = vector.multi_reduction <add>, %28, %cst_9 [1] : vector<8x10xf32> to vector<8xf32>
    %30 = vector.shape_cast %29 : vector<8xf32> to vector<8x1xf32>
    %cst_10 = arith.constant 1.000000e+00 : f32
    %31 = vector.broadcast %cst_10 : f32 to vector<8x1xf32>
    %32 = arith.subf %31, %26 : vector<8x1xf32>
    %33 = arith.mulf %32, %32 : vector<8x1xf32>
    %cst_11 = arith.constant 0.000000e+00 : f32
    %34 = vector.broadcast %cst_11 : f32 to vector<8x1xf32>
    %35 = arith.subf %34, %30 : vector<8x1xf32>
    %36 = arith.mulf %35, %33 : vector<8x1xf32>
    %37 = arith.mulf %36, %25 : vector<8x1xf32>
    %c1_i32 = arith.constant 1 : i32
    %38 = arith.muli %arg0, %c1_i32 : i32
    %39 = arith.addi %38, %arg1 : i32
    %c8_i32 = arith.constant 8 : i32
    %40 = arith.muli %39, %c8_i32 : i32
    %41 = tpu.iota {dimensions = array<i32: 0>} : vector<8x1xi32>
    %42 = vector.broadcast %40 : i32 to vector<8x1xi32>
    %43 = arith.addi %42, %41 : vector<8x1xi32>
    %c8_i32_12 = arith.constant 8 : i32
    %44 = vector.broadcast %c8_i32_12 : i32 to vector<8x1xi32>
    %45 = arith.cmpi slt, %43, %44 : vector<8x1xi32>
    %cst_13 = arith.constant 0.000000e+00 : f32
    %46 = vector.broadcast %cst_13 : f32 to vector<8x1xf32>
    %47 = arith.select %45, %37, %46 : vector<8x1xi1>, vector<8x1xf32>
    %c0_14 = arith.constant 0 : index
    %c0_15 = arith.constant 0 : index
    %c0_16 = arith.constant 0 : index
    %48 = vector.load %arg5[%c0_14, %c0_15, %c0_16] : memref<1x1x1xf32, #tpu.memory_space<vmem>>, vector<1x1x1xf32>
    %49 = vector.shape_cast %47 : vector<8x1xf32> to vector<1x8x1xf32>
    %cst_17 = arith.constant dense<0.000000e+00> : vector<1xf32>
    %50 = vector.multi_reduction <add>, %49, %cst_17 [1, 2] : vector<1x8x1xf32> to vector<1xf32>
    %51 = vector.shape_cast %50 : vector<1xf32> to vector<1x1x1xf32>
    %52 = vector.extract %51[0, 0, 0] : f32 from vector<1x1x1xf32>
    %53 = vector.broadcast %52 : f32 to vector<1x1x1xf32>
    %54 = arith.addf %48, %53 : vector<1x1x1xf32>
    %c0_18 = arith.constant 0 : index
    %c0_19 = arith.constant 0 : index
    %c0_20 = arith.constant 0 : index
    %55 = vector.load %arg5[%c0_18, %c0_19, %c0_20] : memref<1x1x1xf32, #tpu.memory_space<vmem>>, vector<1x1x1xf32>
    tpu.vector_store %arg5[%c0_18, %c0_19, %c0_20], %54 {strides = array<i32>} : memref<1x1x1xf32, #tpu.memory_space<vmem>>, vector<1x1x1xf32>,
    return
  }
  func.func @transform_0(%arg0: i32, %arg1: i32) -> (i32, i32) {
    %c1_i32 = arith.constant 1 : i32
    %0 = arith.muli %arg0, %c1_i32 : i32
    %1 = arith.addi %0, %arg1 : i32
    %c0_i32 = arith.constant 0 : i32
    %c0_i32_0 = arith.constant 0 : i32
    return %1, %c0_i32 : i32, i32
  }
  func.func @transform_1(%arg0: i32, %arg1: i32) -> (i32, i32) {
    %c1_i32 = arith.constant 1 : i32
    %0 = arith.muli %arg0, %c1_i32 : i32
    %1 = arith.addi %0, %arg1 : i32
    %c0_i32 = arith.constant 0 : i32
    %c0_i32_0 = arith.constant 0 : i32
    return %1, %c0_i32 : i32, i32
  }
  func.func @transform_2(%arg0: i32, %arg1: i32) -> (i32, i32) {
    %c0_i32 = arith.constant 0 : i32
    %c0_i32_0 = arith.constant 0 : i32
    %c0_i32_1 = arith.constant 0 : i32
    return %c0_i32, %c0_i32_0 : i32, i32
  }
  func.func @transform_3(%arg0: i32, %arg1: i32) -> (i32, i32, i32) {
    %c0_i32 = arith.constant 0 : i32
    %c0_i32_0 = arith.constant 0 : i32
    %c0_i32_1 = arith.constant 0 : i32
    return %arg0, %c0_i32, %c0_i32_0 : i32, i32, i32
  }
}

</mosaic_0001>

<bundles_post_ra>
// kernel: tpu_custom_call.1
= control target key start
LH: loop header
LB: loop body
LE: loop exit
PB: predicated region body
PF: predicated region fallthrough
CT: control target
= control target key end

     0   :  { %vm66_vm0 = vcmask 80896   ;;  %s240_s0 = inlined_call_operand.vmem [shape: f32[8,10], index: 0, kind: input, shape index: {}]   ;;  %s241_s1 = inlined_call_operand.vmem [shape: s32[8,1], index: 1, kind: input, shape index: {}]   ;;  %s242_s2 = inlined_call_operand.vmem [shape: f32[1,10], index: 2, kind: input, shape index: {}]   ;;  %s243_s3 = inlined_call_operand.hbm [shape: f32[1,1,1], index: 3, kind: output, shape index: {}]  }
   0x1   :  { %v55_v0 = vld [vmem:[%s240_s0] sm:$0xff] }
   0x2   :  { %8 = vsyncpa [#allocation3], 0  ;;  %v67_v1 = vsel %vm66_vm0, %v55_v0, -inf  ;;  %v190_v2 = vmov 0   ;;  %v56_v3 = vld [vmem:[%s241_s1] sm:$0xff]  ;;  %vm53_vm1 = vcmask 0   ;;  %v58_v7 = vlaneseq }
   0x3   :  { %159 = vset.pattern.permute.xlu0 %v190_v2  ;;  %v191_v4 = vmov 0.0   ;;  %v153_v14 = vld [vmem:[%s242_s2] ss:$0 sm:$0xff]  ;;  %vm111_vm3 = vcmask 7168   ;;  %s192_s1 = smov [#allocation2]  }
   0x4   :  { %68 = vmax.xlane.f32.xlu0 %v67_v1  ;;  %54 = vst.msk [vmem:[#allocation2] sm:$0x1] %vm53_vm1, %v191_v4  ;;  %v59_v9 = vand.u32 127, %v58_v7  ;;  %s132_s2 = sshll.u32 %s192_s1, 4  ;;  %s133_s2 = int_to_ptr.vmem [resolvable:$true] %s132_s2 }
   0x5   :  { %s166_s18 = scalar_lea.vmem %s133_s2, 16  ;;  %s170_s19 = scalar_lea.vmem %s133_s2, 32 }
   0x6   :  { %p167_p0 = scmp.ne.s32.totalorder %s133_s2, %s166_s18  ;;  %p171_p1 = scmp.lt.s32.totalorder %s133_s2, %s133_s2 }
   0x7   :  { %p172_p2 = scmp.lt.s32.totalorder %s170_s19, %s166_s18 }
   0x9   :  { %p173_p3 = por %p172_p2, %p171_p1 }
   0xb   :  { %v110_v42 = vld [vmem:[#allocation2] sm:$0x1]  ;;  %p174_p4 = pnand %p173_p3, %p167_p0 }
  0x1a   :  { %61 = vperm.xlu0 %159, %v56_v3  }
  0x91   :  { %v69_v5 = vpop.xlane.xlu0 %68 }
  0x92   :  { %v70_v6 = vsub.f32 %v55_v0, %v69_v5 }
  0x94   :  { %v71_v8 = vmul.f32 1.442695, %v70_v6 }
  0x96   :  { %160 = vpow2.f32 %v71_v8 }
  0x99   :  { %v62_v10 = vpop.permute.xlu0 %61 }
  0x9a   :  { %vm63_vm2 = vcmp.eq.s32.totalorder %v59_v9, %v62_v10 }
  0x9b   :  { %v152_v11 = vsel %vm63_vm2, 1.0, %v191_v4 }
  0x9c   :  { %v76_v12 = vmul.f32 %v152_v11, %v55_v0  ;;  %v93_v17 = vmul.f32 %v153_v14, %v152_v11 }
  0x9e   :  { %v77_v16 = vsel %vm66_vm0, %v76_v12, 0.0  ;;  %v94_v18 = vsel %vm66_vm0, %v93_v17, 0.0 }
  0xa0   :  { %v161_v13 = vpop.eup %160 }
  0xa1   :  { %v73_v15 = vsel %vm66_vm0, %v161_v13, 0.0 }
  0xa2   :  { %74 = vadd.xlane.f32.xlu1 %v73_v15 }
  0xa6   :  { %78 = vadd.xlane.f32.xlu1 %v77_v16 }
  0xaa   :  { %95 = vadd.xlane.f32.xlu1 %v94_v18 }
 0x12f   :  { %v75_v19 = vpop.xlane.xlu1 %74 }
 0x130   :  { %162 = vlog2.f32 %v75_v19 }
 0x133   :  { %v79_v20 = vpop.xlane.xlu1 %78 }
 0x134   :  { %v80_v23 = vsub.f32 %v79_v20, %v69_v5 }
 0x137   :  { %v96_v28 = vpop.xlane.xlu1 %95 }
 0x138   :  { %v99_v31 = vsub.f32 0.0, %v96_v28 }
 0x13a   :  { %v163_v21 = vpop.eup %162 }
 0x13b   :  { %v82_v22 = vmul.f32 0.6931472, %v163_v21 }
 0x13d   :  { %v83_v24 = vsub.f32 %v80_v23, %v82_v22 }
 0x13f   :  { %v84_v25 = vmax.f32 %v83_v24, -9.2103405 }
 0x141   :  { %v85_v26 = vmul.f32 1.442695, %v84_v25 }
 0x143   :  { %164 = vpow2.f32 %v85_v26 }
 0x14d   :  { %v165_v27 = vpop.eup %164 }
 0x14e   :  { %v97_v29 = vsub.f32 1.0, %v165_v27 }
 0x150   :  { %v98_v30 = vmul.f32 %v97_v29, %v97_v29 }
 0x152   :  { %v100_v32 = vmul.f32 %v99_v31, %v98_v30 }
 0x154   :  { %v101_v33 = vmul.f32 %v100_v32, %v84_v25 }
 0x156   :  { %v112_v34 = vsel %vm111_vm3, %v101_v33, 0.0 }
 0x157   :  { %113 = vadd.xlane.f32.xlu1 %v112_v34 }
 0x1e4   :  { %v114_v35 = vpop.xlane.xlu1 %113 }
 0x1e5   :  { %v115_v36 = vrot.slane %v114_v35, 4 }
 0x1e7   :  { %v116_v37 = vadd.f32 %v115_v36, %v114_v35 }
 0x1e9   :  { %v117_v38 = vrot.slane %v116_v37, 2 }
 0x1eb   :  { %v118_v39 = vadd.f32 %v117_v38, %v116_v37 }
 0x1ed   :  { %v119_v40 = vrot.slane %v118_v39, 1 }
 0x1ef   :  { %v120_v41 = vadd.f32 %v119_v40, %v118_v39 }
 0x1f1   :  { %154 = vpush %v120_v41 }
 0x222   :  { %s155_s17 = spop %154 }
 0x223   :  { %v122_v43 = vstv %s155_s17 }
 0x224   :  { %v123_v44 = vadd.f32 %v122_v43, %v110_v42 }
 0x226   :  { %125 = vst.msk [vmem:[#allocation2] sm:$0x1] %vm53_vm1, %v123_v44 }
 0x227   :  { %177 = shalt.err (!%p174_p4)
}
 0x228   :  { %s178_s22 = scalar_lea.hbm %s243_s3, 16 }
 0x229   :  { %p179_p5 = scmp.ne.s32.totalorder %s243_s3, %s178_s22  ;;  %p182_p6 = scmp.lt.u32.totalorder %s178_s22, %s243_s3 }
 0x22b   :  { %p184_p7 = pnand %p182_p6, %p179_p5 }
 0x22d   :  { %187 = shalt.err (!%p184_p7)
}
 0x22e   :  { %135 = dma.vmem_to_hbm [thread:$0]  %s133_s2, 16, %s243_s3, [#allocation3]  }
 0x22f   :  { %188 = dma.done.wait [#allocation3], 16  }
 0x230   :  { %189 = vsyncadd [#allocation3], 4294967280 }
 0x231   :  { %139 = vsyncpa [#allocation3], 1 }

</bundles_post_ra>
